<compile_context>
chip_gen: v7x
topology: tpu7x:2x2x1
jax: 0.10.0
libtpu: 0.0.40
codegen_flags: <defaults>
</compile_context>

<pallas_src>
import functools
import numpy as np
import jax
import jax.numpy as jnp
from jax.experimental import pallas as pl
from jax.experimental.pallas import tpu as pltpu

MXU_DTYPE = jnp.bfloat16          # MXU operand dtype (accumulation stays f32)


def _pick_vmem_limit():
    # ~7/8 of per-core VMEM, capped: 56 MiB on v7x (64 MiB/TC), 100 MiB on v5e/v6e (128 MiB).
    try:
        cap = pltpu.get_tpu_info().vmem_capacity_bytes
    except Exception:
        cap = 64 * 1024 * 1024
    return int(min(cap * 7 // 8, 100 * 1024 * 1024))


_VMEM_LIMIT = _pick_vmem_limit()


def _round_up(x, m):
    return ((x + m - 1) // m) * m


def _row_tile(m_rows, tile_m):
    # Largest row tile <= tile_m, 16-aligned (bf16 sublane packing) unless full extent.
    return min(tile_m, max(16, _round_up(m_rows, 16)))


def _ln(y, g, b):
    mu = jnp.mean(y, axis=-1, keepdims=True)
    yc = y - mu
    var = jnp.mean(yc * yc, axis=-1, keepdims=True)
    return yc * jax.lax.rsqrt(var + 1e-5) * g + b


# --------------------- fused value / (offsets|attn-logits) projections ---------------------

def _fused_proj_kernel(src_ref, pos_ref, wv_ref, bv_ref, wo_ref, bo_ref,
                       val_ref, offaw_ref):
    s = src_ref[...]
    q = (s + pos_ref[...]).astype(MXU_DTYPE)                  # with_pos_embed fused
    v = jnp.dot(s.astype(MXU_DTYPE), wv_ref[...], preferred_element_type=jnp.float32)
    val_ref[...] = (v + bv_ref[...]).astype(val_ref.dtype)
    oa = jnp.dot(q, wo_ref[...], preferred_element_type=jnp.float32)
    offaw_ref[...] = (oa + bo_ref[...]).astype(offaw_ref.dtype)


def fused_proj_pallas(src, pos, wv, bv, wo, bo, tile_m=512):
    M, D = src.shape
    Nv = wv.shape[1]
    No = wo.shape[1]
    tm = _row_tile(M, tile_m)
    grid = (pl.cdiv(M, tm),)
    return pl.pallas_call(
        _fused_proj_kernel,
        out_shape=(jax.ShapeDtypeStruct((M, Nv), MXU_DTYPE),     # value stored bf16
                   jax.ShapeDtypeStruct((M, No), jnp.float32)),  # [offsets | logits]
        grid=grid,
        in_specs=[
            pl.BlockSpec((tm, D), lambda i: (i, 0)),
            pl.BlockSpec((tm, D), lambda i: (i, 0)),
            pl.BlockSpec((D, Nv), lambda i: (0, 0)),
            pl.BlockSpec((1, Nv), lambda i: (0, 0)),
            pl.BlockSpec((D, No), lambda i: (0, 0)),
            pl.BlockSpec((1, No), lambda i: (0, 0)),
        ],
        out_specs=(pl.BlockSpec((tm, Nv), lambda i: (i, 0)),
                   pl.BlockSpec((tm, No), lambda i: (i, 0))),
        compiler_params=pltpu.CompilerParams(
            dimension_semantics=("parallel",), vmem_limit_bytes=_VMEM_LIMIT),
    )(src, pos, wv.astype(MXU_DTYPE), bv.reshape(1, Nv),
      wo.astype(MXU_DTYPE), bo.reshape(1, No))


# ----------------------- multi-scale deformable attention core -----------------------

def _deform_attn_kernel(offaw_ref, refp_ref, value_ref, out_ref, *,
                        spatial_shapes, n_heads, n_points, d_head):
    # Per grid point = one (batch, Lq-tile):
    #   offaw_ref : (tq, heads*L*P*3) f32   -- [sampling offsets | attn logits], lane-dense
    #   refp_ref  : (tq, L*2)         f32   -- reference points, (x, y) per level
    #   value_ref : (Len_in, d_model) bf16  -- natural (head-major columns) layout
    #   out_ref   : (tq, d_model)     bf16
    L = len(spatial_shapes)
    P = n_points
    LP = L * P
    nhp = n_heads * LP
    tq = offaw_ref.shape[0]

    offaw = offaw_ref[...].astype(jnp.float32)
    refp = refp_ref[...].astype(jnp.float32)

    # per-level flattened (x, y) lane coordinates as (1, HW) iotas (broadcast later),
    # level start offsets, and the ref-point pixel base (loc*size - 0.5), hoisted.
    coords, level_start, ref_px = [], [], []
    start = 0
    for l, (Hl, Wl) in enumerate(spatial_shapes):
        HW = Hl * Wl
        c = jax.lax.broadcasted_iota(jnp.float32, (1, HW), 1)
        cy = jnp.floor(c / float(Wl))
        cx = c - cy * float(Wl)
        coords.append((cx, cy))
        level_start.append(start)
        start += HW
        # grid_sample(align_corners=False): pixel coord = loc * size - 0.5 ;
        # loc = ref + off / (W, H)  =>  pixel = ref*size + off - 0.5
        ref_px.append((refp[:, 2 * l:2 * l + 1] * float(Wl) - 0.5,
                       refp[:, 2 * l + 1:2 * l + 2] * float(Hl) - 0.5))

    head_outs = []
    for h in range(n_heads):
        # softmax over (levels, points) for this head; reciprocal on the EUP slot.
        logits = offaw[:, 2 * nhp + h * LP: 2 * nhp + (h + 1) * LP]       # (tq, LP)
        m = jnp.max(logits, axis=-1, keepdims=True)
        e = jnp.exp(logits - m)
        attn_h = e * pl.reciprocal(jnp.sum(e, axis=-1, keepdims=True), approx=True)

        acc = jnp.zeros((tq, d_head), jnp.float32)
        for l, (Hl, Wl) in enumerate(spatial_shapes):
            HW = Hl * Wl
            cx, cy = coords[l]
            rx, ry = ref_px[l]
            S = jnp.zeros((tq, HW), jnp.float32)
            for p in range(P):
                col = (h * LP + l * P + p) * 2
                x = rx + offaw[:, col:col + 1]                             # (tq, 1)
                y = ry + offaw[:, col + 1:col + 2]
                a = attn_h[:, l * P + p:l * P + p + 1]
                # separable "hat" bilinear factors (zero outside -> padding_mode='zeros')
                xf = jnp.maximum(1.0 - jnp.abs(cx - x), 0.0)               # (tq, HW)
                yf = a * jnp.maximum(1.0 - jnp.abs(cy - y), 0.0)
                S = S + xf * yf
            v_l = value_ref[level_start[l]:level_start[l] + HW,
                            h * d_head:(h + 1) * d_head]                   # (HW, d_head) bf16
            acc = acc + jnp.dot(S.astype(MXU_DTYPE), v_l,
                                preferred_element_type=jnp.float32)        # MXU, f32 accum
        head_outs.append(acc)

    # assemble all heads in-register -> one dense (tq, d_model) store
    out_ref[...] = jnp.concatenate(head_outs, axis=-1).astype(out_ref.dtype)


def ms_deform_attn_pallas(value, offaw, ref_points, spatial_shapes, n_heads, n_points,
                          tile_q=64):
    # value      : (N, Len_in, d_model) bf16
    # offaw      : (N, Lq, heads*L*P*3) f32  (offsets then logits, lane-dense)
    # ref_points : (N, Lq, L*2) f32
    N, Len_in, d_model = value.shape
    _, Lq, _ = offaw.shape
    L = len(spatial_shapes)
    d_head = d_model // n_heads
    nhp3 = n_heads * L * n_points * 3
    tq = Lq if Lq <= tile_q else tile_q
    grid = (N, pl.cdiv(Lq, tq))
    kernel = functools.partial(_deform_attn_kernel, spatial_shapes=spatial_shapes,
                               n_heads=n_heads, n_points=n_points, d_head=d_head)
    return pl.pallas_call(
        kernel,
        out_shape=jax.ShapeDtypeStruct((N, Lq, d_model), MXU_DTYPE),
        grid=grid,
        in_specs=[
            pl.BlockSpec((None, tq, nhp3), lambda n, q: (n, q, 0)),
            pl.BlockSpec((None, tq, 2 * L), lambda n, q: (n, q, 0)),
            pl.BlockSpec((None, Len_in, d_model), lambda n, q: (n, 0, 0)),
        ],
        out_specs=pl.BlockSpec((None, tq, d_model), lambda n, q: (n, q, 0)),
        compiler_params=pltpu.CompilerParams(
            dimension_semantics=("parallel", "parallel"),
            vmem_limit_bytes=_VMEM_LIMIT),
    )(offaw, ref_points, value)


# ------------- fused epilogue: output_proj + res + norm1 + FFN + res + norm2 -------------

def _proj_ffn_ln_kernel(x_ref, res_ref, wo_ref, bo_ref, g1_ref, be1_ref,
                        w1_ref, b1_ref, w2_ref, b2_ref, g2_ref, be2_ref, o_ref):
    y = jnp.dot(x_ref[...].astype(MXU_DTYPE), wo_ref[...],
                preferred_element_type=jnp.float32)
    y = y + bo_ref[...] + res_ref[...].astype(jnp.float32)
    h1 = _ln(y, g1_ref[...], be1_ref[...])                                # norm1
    h = jnp.dot(h1.astype(MXU_DTYPE), w1_ref[...], preferred_element_type=jnp.float32)
    h = jnp.maximum(h + b1_ref[...], 0.0)                                 # (tm, d_ffn) on-chip
    y2 = jnp.dot(h.astype(MXU_DTYPE), w2_ref[...], preferred_element_type=jnp.float32)
    y2 = y2 + b2_ref[...] + h1
    o_ref[...] = _ln(y2, g2_ref[...], be2_ref[...]).astype(o_ref.dtype)   # norm2


def proj_ffn_ln_pallas(x, res, wo, bo, g1, be1, w1, b1, w2, b2, g2, be2, tile_m=512):
    M, D = x.shape
    F = w1.shape[1]
    tm = _row_tile(M, tile_m)
    grid = (pl.cdiv(M, tm),)
    row = lambda i: (i, 0)
    rep = lambda i: (0, 0)
    return pl.pallas_call(
        _proj_ffn_ln_kernel,
        out_shape=jax.ShapeDtypeStruct((M, D), jnp.float32),
        grid=grid,
        in_specs=[
            pl.BlockSpec((tm, D), row),    # attention output
            pl.BlockSpec((tm, D), row),    # residual (src)
            pl.BlockSpec((D, D), rep),     # output_proj W
            pl.BlockSpec((1, D), rep),     # output_proj b
            pl.BlockSpec((1, D), rep),     # norm1 gamma
            pl.BlockSpec((1, D), rep),     # norm1 beta
            pl.BlockSpec((D, F), rep),     # linear1 W
            pl.BlockSpec((1, F), rep),     # linear1 b
            pl.BlockSpec((F, D), rep),     # linear2 W
            pl.BlockSpec((1, D), rep),     # linear2 b
            pl.BlockSpec((1, D), rep),     # norm2 gamma
            pl.BlockSpec((1, D), rep),     # norm2 beta
        ],
        out_specs=pl.BlockSpec((tm, D), row),
        compiler_params=pltpu.CompilerParams(
            dimension_semantics=("parallel",), vmem_limit_bytes=_VMEM_LIMIT),
    )(x, res, wo.astype(MXU_DTYPE), bo.reshape(1, D), g1.reshape(1, D), be1.reshape(1, D),
      w1.astype(MXU_DTYPE), b1.reshape(1, F), w2.astype(MXU_DTYPE), b2.reshape(1, D),
      g2.reshape(1, D), be2.reshape(1, D))


# ----------------------------- full encoder layer forward -----------------------------

def deformable_encoder_layer_forward(params, src, pos, reference_points, spatial_shapes,
                                     tile_m=512, tile_q=64):
    """DeformableTransformerEncoderLayer.forward (eval mode, no padding_mask)."""
    N, Len_in, d_model = src.shape
    Lq = reference_points.shape[1]
    L = len(spatial_shapes)
    heads = params["n_heads"]
    P = params["n_points"]
    assert Lq == Len_in, "encoder self-attention assumes queries == flattened input"
    assert Len_in == sum(h * w for h, w in spatial_shapes)
    assert d_model % heads == 0
    nhp = heads * L * P

    src2d = src.reshape(N * Len_in, d_model)
    pos2d = pos.reshape(N * Len_in, d_model)

    # fused projections: value = src @ Wv ; [sampling_offsets | attn_logits] = (src+pos) @ [Wo|Wa]
    wo = jnp.concatenate([params["sampling_offsets_w"], params["attn_weights_w"]], axis=1)
    bo = jnp.concatenate([params["sampling_offsets_b"], params["attn_weights_b"]], axis=0)
    value2d, offaw2d = fused_proj_pallas(src2d, pos2d,
                                         params["value_proj_w"], params["value_proj_b"],
                                         wo, bo, tile_m=tile_m)
    # TODO(synk): padding_mask support (masked_fill of value rows) not exercised here.

    # deform-attn core consumes the raw projection rows + flattened reference points;
    # loc computation, softmax and layout handling all happen inside the kernel
    # (only free, contiguous reshapes below -> no XLA transposes / HBM round trips).
    value = value2d.reshape(N, Len_in, d_model)
    offaw = offaw2d.reshape(N, Lq, nhp * 3)
    refp = reference_points.reshape(N, Lq, L * 2)
    attn_out = ms_deform_attn_pallas(value, offaw, refp, spatial_shapes, heads, P,
                                     tile_q=tile_q)

    # fused epilogue: output_proj + residual + norm1 + FFN + residual + norm2
    out2d = proj_ffn_ln_pallas(attn_out.reshape(N * Lq, d_model), src2d,
                               params["output_proj_w"], params["output_proj_b"],
                               params["norm1_g"], params["norm1_b"],
                               params["linear1_w"], params["linear1_b"],
                               params["linear2_w"], params["linear2_b"],
                               params["norm2_g"], params["norm2_b"], tile_m=tile_m)
    return out2d.reshape(N, Len_in, d_model)


# ------------------------------- pure-JAX reference -------------------------------

def reference_forward(params, src, pos, reference_points, spatial_shapes):
    N, Len_in, d_model = src.shape
    Lq = reference_points.shape[1]
    L = len(spatial_shapes)
    heads = params["n_heads"]
    P = params["n_points"]
    d_head = d_model // heads

    q = src + pos
    value = src @ params["value_proj_w"] + params["value_proj_b"]
    off = q @ params["sampling_offsets_w"] + params["sampling_offsets_b"]
    aw = q @ params["attn_weights_w"] + params["attn_weights_b"]

    value_heads = value.reshape(N, Len_in, heads, d_head).transpose(0, 2, 1, 3)
    off = off.reshape(N, Lq, heads, L, P, 2)
    aw = jax.nn.softmax(aw.reshape(N, Lq, heads, L * P), axis=-1).reshape(N, Lq, heads, L, P)

    wh = jnp.array([[w, h] for (h, w) in spatial_shapes], jnp.float32)
    loc = reference_points[:, :, None, :, None, :] + off / wh[None, None, None, :, None, :]
    lx = jnp.transpose(loc[..., 0], (0, 2, 1, 3, 4))    # (N, heads, Lq, L, P)
    ly = jnp.transpose(loc[..., 1], (0, 2, 1, 3, 4))
    at = jnp.transpose(aw, (0, 2, 1, 3, 4))

    out = jnp.zeros((N, heads, Lq, d_head), jnp.float32)
    start = 0
    for l, (H, W) in enumerate(spatial_shapes):
        HW = H * W
        v_l = value_heads[:, :, start:start + HW, :]
        x = lx[:, :, :, l, :] * W - 0.5
        y = ly[:, :, :, l, :] * H - 0.5
        a = at[:, :, :, l, :]
        x0f = jnp.floor(x)
        y0f = jnp.floor(y)
        fx = x - x0f
        fy = y - y0f
        x0 = x0f.astype(jnp.int32)
        y0 = y0f.astype(jnp.int32)
        for dy, dx, w in ((0, 0, (1 - fy) * (1 - fx)), (0, 1, (1 - fy) * fx),
                          (1, 0, fy * (1 - fx)), (1, 1, fy * fx)):
            xi = x0 + dx
            yi = y0 + dy
            valid = (xi >= 0) & (xi < W) & (yi >= 0) & (yi < H)
            wgt = jnp.where(valid, w * a, 0.0)
            idx = jnp.clip(yi * W + xi, 0, HW - 1)
            g = jnp.take_along_axis(v_l, idx.reshape(N, heads, Lq * P, 1),
                                    axis=2).reshape(N, heads, Lq, P, d_head)
            out = out + jnp.sum(g * wgt[..., None], axis=3)
        start += HW

    attn_out = out.transpose(0, 2, 1, 3).reshape(N, Lq, d_model)
    src2 = attn_out @ params["output_proj_w"] + params["output_proj_b"]

    def ln(x, g, b):
        mu = jnp.mean(x, -1, keepdims=True)
        xc = x - mu
        var = jnp.mean(xc * xc, -1, keepdims=True)
        return xc * jax.lax.rsqrt(var + 1e-5) * g + b

    h1 = ln(src + src2, params["norm1_g"], params["norm1_b"])
    ffn = jnp.maximum(h1 @ params["linear1_w"] + params["linear1_b"], 0.0)
    ffn = ffn @ params["linear2_w"] + params["linear2_b"]
    return ln(h1 + ffn, params["norm2_g"], params["norm2_b"])


# ----------------------------------- parameters -----------------------------------

def init_params(key, d_model, d_ffn, n_levels, n_heads, n_points):
    ks = jax.random.split(key, 12)

    def w(k, shape, scale=0.05):
        return jax.random.normal(k, shape, jnp.float32) * scale

    nhp = n_heads * n_levels * n_points
    p = {"n_heads": n_heads, "n_points": n_points}
    # weights stored as (in_features, out_features)  == torch Linear weight.T
    p["sampling_offsets_w"] = w(ks[0], (d_model, nhp * 2))
    p["sampling_offsets_b"] = w(ks[1], (nhp * 2,), 0.5)
    p["attn_weights_w"] = w(ks[2], (d_model, nhp))
    p["attn_weights_b"] = jnp.zeros((nhp,), jnp.float32)
    p["value_proj_w"] = w(ks[3], (d_model, d_model))
    p["value_proj_b"] = w(ks[4], (d_model,), 0.02)
    p["output_proj_w"] = w(ks[5], (d_model, d_model))
    p["output_proj_b"] = w(ks[6], (d_model,), 0.02)
    p["norm1_g"] = jnp.ones((d_model,), jnp.float32)
    p["norm1_b"] = jnp.zeros((d_model,), jnp.float32)
    p["linear1_w"] = w(ks[7], (d_model, d_ffn))
    p["linear1_b"] = w(ks[8], (d_ffn,), 0.02)
    p["linear2_w"] = w(ks[9], (d_ffn, d_model))
    p["linear2_b"] = w(ks[10], (d_model,), 0.02)
    p["norm2_g"] = jnp.ones((d_model,), jnp.float32)
    p["norm2_b"] = jnp.zeros((d_model,), jnp.float32)
    return p


# -------------------------------------- main --------------------------------------

if __name__ == "__main__":
    d_model, d_ffn, n_levels, n_heads, n_points = 32, 64, 2, 4, 2
    spatial_shapes = ((8, 8), (4, 4))                   # static (H, W) per level
    N = 2
    Len_in = sum(h * w for h, w in spatial_shapes)      # 80
    Lq = Len_in

    key = jax.random.PRNGKey(0)
    k1, k2, k3, kp = jax.random.split(key, 4)
    src = jax.random.normal(k1, (N, Len_in, d_model), jnp.float32)
    pos = jax.random.normal(k2, (N, Len_in, d_model), jnp.float32) * 0.1
    reference_points = jax.random.uniform(k3, (N, Lq, n_levels, 2), jnp.float32)
    params = init_params(kp, d_model, d_ffn, n_levels, n_heads, n_points)

    out = deformable_encoder_layer_forward(params, src, pos, reference_points, spatial_shapes)
    out = jax.block_until_ready(out)

    ref = jax.block_until_ready(
        reference_forward(params, src, pos, reference_points, spatial_shapes))
    np.testing.assert_allclose(np.asarray(out), np.asarray(ref), rtol=5e-2, atol=5e-2)

    print("KERNEL_OK")
</pallas_src>

<mosaic_0001>
module attributes {stable_mosaic.version = 11 : i64} {
  func.func @_fused_proj_kernel(%arg0: i32, %arg1: memref<160x32xf32, #tpu.memory_space<vmem>>, %arg2: memref<160x32xf32, #tpu.memory_space<vmem>>, %arg3: memref<32x32xbf16, #tpu.memory_space<vmem>>, %arg4: memref<1x32xf32, #tpu.memory_space<vmem>>, %arg5: memref<32x48xbf16, #tpu.memory_space<vmem>>, %arg6: memref<1x48xf32, #tpu.memory_space<vmem>>, %arg7: memref<160x32xbf16, #tpu.memory_space<vmem>>, %arg8: memref<160x48xf32, #tpu.memory_space<vmem>>) attributes {dimension_semantics = [#tpu.dimension_semantics<parallel>], iteration_bounds = array<i64: 1>, scalar_prefetch = 0 : i64, scratch_operands = 0 : i64, tpu.core_type = #tpu.core_type<tc>, window_params = [{transform_indices = @transform_0, window_bounds = array<i64: 160, 32>}, {transform_indices = @transform_1, window_bounds = array<i64: 160, 32>}, {pipeline_mode = #tpu.pipeline_mode<synchronous>, transform_indices = @transform_2, window_bounds = array<i64: 32, 32>}, {pipeline_mode = #tpu.pipeline_mode<synchronous>, transform_indices = @transform_3, window_bounds = array<i64: 1, 32>}, {pipeline_mode = #tpu.pipeline_mode<synchronous>, transform_indices = @transform_4, window_bounds = array<i64: 32, 48>}, {pipeline_mode = #tpu.pipeline_mode<synchronous>, transform_indices = @transform_5, window_bounds = array<i64: 1, 48>}, {transform_indices = @transform_6, window_bounds = array<i64: 160, 32>}, {transform_indices = @transform_7, window_bounds = array<i64: 160, 48>}]} {
    %c0 = arith.constant 0 : index
    %c0_0 = arith.constant 0 : index
    %0 = vector.load %arg1[%c0, %c0_0] : memref<160x32xf32, #tpu.memory_space<vmem>>, vector<160x32xf32>
    %c0_1 = arith.constant 0 : index
    %c0_2 = arith.constant 0 : index
    %1 = vector.load %arg2[%c0_1, %c0_2] : memref<160x32xf32, #tpu.memory_space<vmem>>, vector<160x32xf32>
    %2 = arith.addf %0, %1 : vector<160x32xf32>
    %3 = arith.truncf %2 : vector<160x32xf32> to vector<160x32xbf16>
    %4 = arith.truncf %0 : vector<160x32xf32> to vector<160x32xbf16>
    %c0_3 = arith.constant 0 : index
    %c0_4 = arith.constant 0 : index
    %5 = vector.load %arg3[%c0_3, %c0_4] : memref<32x32xbf16, #tpu.memory_space<vmem>>, vector<32x32xbf16>
    %cst = arith.constant dense<0.000000e+00> : vector<160x32xf32>
    %6 = tpu.matmul %4, %5, %cst {dimension_numbers = #tpu.dot_dimension_numbers<[1], [0], [0], [1], [0, 0, 1, 1], [], []>} : vector<160x32xbf16>, vector<32x32xbf16>, vector<160x32xf32> -> vector<160x32xf32>
    %c0_5 = arith.constant 0 : index
    %c0_6 = arith.constant 0 : index
    %7 = vector.load %arg4[%c0_5, %c0_6] : memref<1x32xf32, #tpu.memory_space<vmem>>, vector<1x32xf32>
    %8 = vector.broadcast %7 : vector<1x32xf32> to vector<160x32xf32>
    %9 = arith.addf %6, %8 : vector<160x32xf32>
    %10 = arith.truncf %9 : vector<160x32xf32> to vector<160x32xbf16>
    %c0_7 = arith.constant 0 : index
    %c0_8 = arith.constant 0 : index
    %11 = vector.load %arg7[%c0_7, %c0_8] : memref<160x32xbf16, #tpu.memory_space<vmem>>, vector<160x32xbf16>
    tpu.vector_store %arg7[%c0_7, %c0_8], %10 {strides = array<i32>} : memref<160x32xbf16, #tpu.memory_space<vmem>>, vector<160x32xbf16>,
    %c0_9 = arith.constant 0 : index
    %c0_10 = arith.constant 0 : index
    %12 = vector.load %arg5[%c0_9, %c0_10] : memref<32x48xbf16, #tpu.memory_space<vmem>>, vector<32x48xbf16>
    %cst_11 = arith.constant dense<0.000000e+00> : vector<160x48xf32>
    %13 = tpu.matmul %3, %12, %cst_11 {dimension_numbers = #tpu.dot_dimension_numbers<[1], [0], [0], [1], [0, 0, 1, 1], [], []>} : vector<160x32xbf16>, vector<32x48xbf16>, vector<160x48xf32> -> vector<160x48xf32>
    %c0_12 = arith.constant 0 : index
    %c0_13 = arith.constant 0 : index
    %14 = vector.load %arg6[%c0_12, %c0_13] : memref<1x48xf32, #tpu.memory_space<vmem>>, vector<1x48xf32>
    %15 = vector.broadcast %14 : vector<1x48xf32> to vector<160x48xf32>
    %16 = arith.addf %13, %15 : vector<160x48xf32>
    %c0_14 = arith.constant 0 : index
    %c0_15 = arith.constant 0 : index
    %17 = vector.load %arg8[%c0_14, %c0_15] : memref<160x48xf32, #tpu.memory_space<vmem>>, vector<160x48xf32>
    tpu.vector_store %arg8[%c0_14, %c0_15], %16 {strides = array<i32>} : memref<160x48xf32, #tpu.memory_space<vmem>>, vector<160x48xf32>,
    return
  }
  func.func @transform_0(%arg0: i32) -> (i32, i32) {
    %c0_i32 = arith.constant 0 : i32
    %c0_i32_0 = arith.constant 0 : i32
    return %arg0, %c0_i32 : i32, i32
  }
  func.func @transform_1(%arg0: i32) -> (i32, i32) {
    %c0_i32 = arith.constant 0 : i32
    %c0_i32_0 = arith.constant 0 : i32
    return %arg0, %c0_i32 : i32, i32
  }
  func.func @transform_2(%arg0: i32) -> (i32, i32) {
    %c0_i32 = arith.constant 0 : i32
    %c0_i32_0 = arith.constant 0 : i32
    %c0_i32_1 = arith.constant 0 : i32
    return %c0_i32, %c0_i32_0 : i32, i32
  }
  func.func @transform_3(%arg0: i32) -> (i32, i32) {
    %c0_i32 = arith.constant 0 : i32
    %c0_i32_0 = arith.constant 0 : i32
    %c0_i32_1 = arith.constant 0 : i32
    return %c0_i32, %c0_i32_0 : i32, i32
  }
  func.func @transform_4(%arg0: i32) -> (i32, i32) {
    %c0_i32 = arith.constant 0 : i32
    %c0_i32_0 = arith.constant 0 : i32
    %c0_i32_1 = arith.constant 0 : i32
    return %c0_i32, %c0_i32_0 : i32, i32
  }
  func.func @transform_5(%arg0: i32) -> (i32, i32) {
    %c0_i32 = arith.constant 0 : i32
    %c0_i32_0 = arith.constant 0 : i32
    %c0_i32_1 = arith.constant 0 : i32
    return %c0_i32, %c0_i32_0 : i32, i32
  }
  func.func @transform_6(%arg0: i32) -> (i32, i32) {
    %c0_i32 = arith.constant 0 : i32
    %c0_i32_0 = arith.constant 0 : i32
    return %arg0, %c0_i32 : i32, i32
  }
  func.func @transform_7(%arg0: i32) -> (i32, i32) {
    %c0_i32 = arith.constant 0 : i32
    %c0_i32_0 = arith.constant 0 : i32
    return %arg0, %c0_i32 : i32, i32
  }
}

</mosaic_0001>

<bundles_post_ra>
// kernel: tpu_custom_call.1
= control target key start
LH: loop header
LB: loop body
LE: loop exit
PB: predicated region body
PF: predicated region fallthrough
CT: control target
= control target key end

     0   :  { %vm129_vm0 = vcmask 261120   ;;  %vm540_vm1 = vcmask 392192   ;;  %vm353_vm2 = vcmask 257024   ;;  %s1113_s2 = inlined_call_operand.vmem [shape: bf16[32,32], index: 2, kind: input, shape index: {}]   ;;  %s1114_s4 = inlined_call_operand.vmem [shape: bf16[32,48], index: 4, kind: input, shape index: {}]   ;;  %s1115_s0 = inlined_call_operand.vmem [shape: f32[160,32], index: 0, kind: input, shape index: {}]   ;;  %s1116_s1 = inlined_call_operand.vmem [shape: f32[160,32], index: 1, kind: input, shape index: {}]   ;;  %s1117_s3 = inlined_call_operand.vmem [shape: f32[1,32], index: 3, kind: input, shape index: {}]   ;;  %s1118_s5 = inlined_call_operand.vmem [shape: f32[1,48], index: 5, kind: input, shape index: {}]   ;;  %s1119_s7 = inlined_call_operand.vmem [shape: f32[160,48], index: 7, kind: output, shape index: {1}]   ;;  %s1120_s6 = inlined_call_operand.vmem [shape: bf16[160,32], index: 6, kind: output, shape index: {0}]  }
   0x1   :  { %v707_v0 = vld [vmem:[%s1113_s2] sm:$0xff]   ;;  %v709_v2 = vld [vmem:[%s1113_s2 + $0x8] sm:$0xff]   ;;  %v28_v10 = vld [vmem:[%s1115_s0 + $0x10] sm:$0xff] }
   0x2   :  { %v708_v1 = vld [vmem:[%s1114_s4] sm:$0xff]   ;;  %659 = vmatprep.subr.bf16.mxu0 %v707_v0  ;;  %v710_v3 = vld [vmem:[%s1114_s4 + $0x8] sm:$0xff]   ;;  %v29_v11 = vld [vmem:[%s1115_s0 + $0x18] sm:$0xff] }
   0x3   :  { %683 = vmatprep.subr.bf16.mxu1 %v708_v1  ;;  %660 = vmatpush3.bf16.msra.mxu0 %v707_v0  ;;  %v26_v4 = vld [vmem:[%s1115_s0] sm:$0xff]  ;;  %v27_v5 = vld [vmem:[%s1115_s0 + $0x8] sm:$0xff]  ;;  %v97_v13 = vpack.c.bf16 %v29_v11, %v28_v10  ;;  %v48_v14 = vld [vmem:[%s1116_s1 + $0x10] sm:$0xff] }
   0x4   :  { %684 = vmatpush3.bf16.msra.mxu1 %v708_v1  ;;  %661 = vmatprep.subr.bf16.mxu0 %v709_v2  ;;  %v46_v6 = vld [vmem:[%s1116_s1] sm:$0xff]  ;;  %v96_v7 = vpack.c.bf16 %v27_v5, %v26_v4  ;;  %v47_v8 = vld [vmem:[%s1116_s1 + $0x8] sm:$0xff]  ;;  %v49_v15 = vld [vmem:[%s1116_s1 + $0x18] sm:$0xff]  ;;  %v68_v17 = vadd.f32 %v48_v14, %v28_v10 }
   0x5   :  { %685 = vmatprep.subr.bf16.mxu1 %v710_v3  ;;  %v66_v9 = vadd.f32 %v46_v6, %v26_v4  ;;  %v67_v12 = vadd.f32 %v47_v8, %v27_v5  ;;  %v30_v16 = vld [vmem:[%s1115_s0 + $0x20] sm:$0xff]  ;;  %v69_v18 = vadd.f32 %v49_v15, %v29_v11  ;;  %v31_v19 = vld [vmem:[%s1115_s0 + $0x28] sm:$0xff]  ;;  %v32_v26 = vld [vmem:[%s1115_s0 + $0x30] sm:$0xff] }
   0x6   :  { %663 = vmatprep.mubr.msk.bf16.mxu0 %vm129_vm0, %v96_v7  ;;  %v50_v20 = vld [vmem:[%s1116_s1 + $0x20] sm:$0xff]  ;;  %v51_v21 = vld [vmem:[%s1116_s1 + $0x28] sm:$0xff]  ;;  %v98_v23 = vpack.c.bf16 %v31_v19, %v30_v16  ;;  %v33_v27 = vld [vmem:[%s1115_s0 + $0x38] sm:$0xff] }
   0x7   :  { %662 = vmatpush3.bf16.msra.mxu0 %v709_v2  ;;  %v86_v22 = vpack.c.bf16 %v67_v12, %v66_v9  ;;  %v70_v24 = vadd.f32 %v50_v20, %v30_v16  ;;  %v71_v25 = vadd.f32 %v51_v21, %v31_v19  ;;  %v52_v28 = vld [vmem:[%s1116_s1 + $0x30] sm:$0xff]  ;;  %v87_v29 = vpack.c.bf16 %v69_v18, %v68_v17  ;;  %v53_v30 = vld [vmem:[%s1116_s1 + $0x38] sm:$0xff]  ;;  %v34_v31 = vld [vmem:[%s1115_s0 + $0x40] sm:$0xff] }
   0x8   :  { %686 = vmatpush3.bf16.msra.mxu1 %v710_v3  ;;  %v35_v32 = vld [vmem:[%s1115_s0 + $0x48] sm:$0xff]  ;;  %v54_v34 = vld [vmem:[%s1116_s1 + $0x40] sm:$0xff]  ;;  %v72_v36 = vadd.f32 %v52_v28, %v32_v26  ;;  %v73_v37 = vadd.f32 %v53_v30, %v33_v27  ;;  %v99_v40 = vpack.c.bf16 %v33_v27, %v32_v26  ;;  %v36_v43 = vld [vmem:[%s1115_s0 + $0x50] sm:$0xff] }
   0x9   :  { %687 = vmatprep.mubr.msk.bf16.mxu1 %vm129_vm0, %v86_v22  ;;  %v88_v33 = vpack.c.bf16 %v71_v25, %v70_v24  ;;  %v55_v35 = vld [vmem:[%s1116_s1 + $0x48] sm:$0xff]  ;;  %v74_v38 = vadd.f32 %v54_v34, %v34_v31  ;;  %v100_v42 = vpack.c.bf16 %v35_v32, %v34_v31  ;;  %v37_v44 = vld [vmem:[%s1115_s0 + $0x58] sm:$0xff]  ;;  %v56_v46 = vld [vmem:[%s1116_s1 + $0x50] sm:$0xff] }
   0xa   :  { %664 = vmatmul.mubr.msk.bf16.vlgmr.msra.gmra.mrb[0].mxu0 %vm129_vm0, %v97_v13  ;;  %v75_v39 = vadd.f32 %v55_v35, %v35_v32  ;;  %v89_v41 = vpack.c.bf16 %v73_v37, %v72_v36  ;;  %v57_v47 = vld [vmem:[%s1116_s1 + $0x58] sm:$0xff]  ;;  %v38_v48 = vld [vmem:[%s1115_s0 + $0x60] sm:$0xff]  ;;  %v39_v49 = vld [vmem:[%s1115_s0 + $0x68] sm:$0xff]  ;;  %v76_v52 = vadd.f32 %v56_v46, %v36_v43  ;;  %v101_v56 = vpack.c.bf16 %v37_v44, %v36_v43 }
   0xb   :  { %688 = vmatmul.mubr.msk.bf16.vlgmr.msra.gmra.mrb[0].mxu1 %vm129_vm0, %v87_v29  ;;  %667 = vmatprep.mubr.msk.bf16.mxu0 %vm129_vm0, %v98_v23  ;;  %v58_v50 = vld [vmem:[%s1116_s1 + $0x60] sm:$0xff]  ;;  %v59_v51 = vld [vmem:[%s1116_s1 + $0x68] sm:$0xff]  ;;  %v77_v53 = vadd.f32 %v57_v47, %v37_v44  ;;  %v102_v58 = vpack.c.bf16 %v39_v49, %v38_v48  ;;  %v40_v59 = vld [vmem:[%s1115_s0 + $0x70] sm:$0xff] }
   0xc   :  { %691 = vmatprep.mubr.msk.bf16.mxu1 %vm129_vm0, %v88_v33  ;;  %v90_v45 = vpack.c.bf16 %v75_v39, %v74_v38  ;;  %v78_v54 = vadd.f32 %v58_v50, %v38_v48  ;;  %v79_v55 = vadd.f32 %v59_v51, %v39_v49  ;;  %v41_v60 = vld [vmem:[%s1115_s0 + $0x78] sm:$0xff]  ;;  %v60_v62 = vld [vmem:[%s1116_s1 + $0x70] sm:$0xff]  ;;  %v42_v0 = vld [vmem:[%s1115_s0 + $0x80] sm:$0xff] }
   0xd   :  { %v91_v57 = vpack.c.bf16 %v77_v53, %v76_v52  ;;  %v61_v63 = vld [vmem:[%s1116_s1 + $0x78] sm:$0xff]  ;;  %v43_v1 = vld [vmem:[%s1115_s0 + $0x88] sm:$0xff]  ;;  %v62_v2 = vld [vmem:[%s1116_s1 + $0x80] sm:$0xff]  ;;  %v80_v4 = vadd.f32 %v60_v62, %v40_v59  ;;  %v103_v8 = vpack.c.bf16 %v41_v60, %v40_v59 }
   0xe   :  { %v92_v61 = vpack.c.bf16 %v79_v55, %v78_v54  ;;  %v63_v3 = vld [vmem:[%s1116_s1 + $0x88] sm:$0xff]  ;;  %v81_v5 = vadd.f32 %v61_v63, %v41_v60  ;;  %v82_v6 = vadd.f32 %v62_v2, %v42_v0  ;;  %v104_v10 = vpack.c.bf16 %v43_v1, %v42_v0  ;;  %v44_v11 = vld [vmem:[%s1115_s0 + $0x90] sm:$0xff]  ;;  %v45_v13 = vld [vmem:[%s1115_s0 + $0x98] sm:$0xff] }
   0xf   :  { %v83_v7 = vadd.f32 %v63_v3, %v43_v1  ;;  %v64_v14 = vld [vmem:[%s1116_s1 + $0x90] sm:$0xff]  ;;  %v65_v15 = vld [vmem:[%s1116_s1 + $0x98] sm:$0xff]  ;;  %v105_v18 = vpack.c.bf16 %v45_v13, %v44_v11  ;;  %v906_v20 = vld [vmem:[%s1117_s3] ss:$0 sm:$0xff] }
  0x10   :  { %v93_v9 = vpack.c.bf16 %v81_v5, %v80_v4  ;;  %v84_v16 = vadd.f32 %v64_v14, %v44_v11  ;;  %v85_v17 = vadd.f32 %v65_v15, %v45_v13  ;;  %v911_v21 = vld [vmem:[%s1118_s5] ss:$0 sm:$0xff] }
  0x11   :  { %v94_v12 = vpack.c.bf16 %v83_v7, %v82_v6 }
  0x12   :  { %668 = vmatmul.mubr.msk.bf16.gmra.mrb[4].mxu0 %vm129_vm0, %v99_v40  ;;  %v95_v19 = vpack.c.bf16 %v85_v17, %v84_v16 }
  0x13   :  { %692 = vmatmul.mubr.msk.bf16.gmra.mrb[4].mxu1 %vm129_vm0, %v89_v41  ;;  %671 = vmatprep.mubr.msk.bf16.mxu0 %vm129_vm0, %v100_v42 }
  0x14   :  { %695 = vmatprep.mubr.msk.bf16.mxu1 %vm129_vm0, %v90_v45 }
  0x1a   :  { %672 = vmatmul.mubr.msk.bf16.gmra.mrb[8].mxu0 %vm129_vm0, %v101_v56 }
  0x1b   :  { %696 = vmatmul.mubr.msk.bf16.gmra.mrb[8].mxu1 %vm129_vm0, %v91_v57  ;;  %675 = vmatprep.mubr.msk.bf16.mxu0 %vm129_vm0, %v102_v58 }
  0x1c   :  { %699 = vmatprep.mubr.msk.bf16.mxu1 %vm129_vm0, %v92_v61 }
  0x22   :  { %676 = vmatmul.mubr.msk.bf16.gmra.mrb[12].mxu0 %vm129_vm0, %v103_v8 }
  0x23   :  { %700 = vmatmul.mubr.msk.bf16.gmra.mrb[12].mxu1 %vm129_vm0, %v93_v9  ;;  %679 = vmatprep.mubr.msk.bf16.mxu0 %vm129_vm0, %v104_v10 }
  0x24   :  { %703 = vmatprep.mubr.msk.bf16.mxu1 %vm129_vm0, %v94_v12 }
  0x2a   :  { %680 = vmatmul.mubr.msk.bf16.gmra.mrb[16].mxu0 %vm129_vm0, %v105_v18 }
  0x2b   :  { %704 = vmatmul.mubr.msk.bf16.gmra.mrb[16].mxu1 %vm129_vm0, %v95_v19 }
  0xdd   :  { %v665_v22 = vpop.f32.mrb[0].mxu0 }
  0xde   :  { %v203_v23 = vadd.f32 %v665_v22, %v906_v20  ;;  %v689_v24 = vpop.f32.mrb[0].mxu1  ;;  %v194_v25 = vpop.f32.mrb[1].mxu0 }
  0xdf   :  { %v470_v26 = vadd.f32 %v689_v24, %v911_v21  ;;  %v195_v27 = vadd.f32 %v906_v20, %v194_v25  ;;  %v461_v28 = vpop.f32.mrb[1].mxu1  ;;  %v666_v29 = vpop.f32.mrb[2].mxu0 }
  0xe0   :  { %v617_v30 = vpack.c.bf16 %v203_v23, %v203_v23  ;;  %v462_v31 = vadd.f32 %v911_v21, %v461_v28  ;;  %v206_v32 = vadd.f32 %v666_v29, %v906_v20  ;;  %v690_v33 = vpop.f32.mrb[2].mxu1  ;;  %v197_v34 = vpop.f32.mrb[3].mxu0 }
  0xe1   :  { %543 = vst.msk [vmem:[%s1119_s7 + $0x10] sm:$0xff] %vm540_vm1, %v470_v26  ;;  %v615_v35 = vpack.c.bf16 %v195_v27, %v195_v27  ;;  %v473_v36 = vadd.f32 %v690_v33, %v911_v21  ;;  %v198_v37 = vadd.f32 %v906_v20, %v197_v34  ;;  %v464_v38 = vpop.f32.mrb[3].mxu1 }
  0xe2   :  { %356 = vst.msk [vmem:[%s1120_s6 + $0x8] sm:$0xf] %vm353_vm2, %v617_v30  ;;  %v618_v39 = vpack.c.bf16 %v206_v32, %v206_v32  ;;  %v465_v40 = vadd.f32 %v911_v21, %v464_v38 }
  0xe3   :  { %541 = vst.msk [vmem:[%s1119_s7] sm:$0xff] %vm540_vm1, %v462_v31  ;;  %544 = vst.msk [vmem:[%s1119_s7 + $0x18] sm:$0xff] %vm540_vm1, %v473_v36  ;;  %v616_v41 = vpack.c.bf16 %v198_v37, %v198_v37 }
  0xe4   :  { %354 = vst.msk [vmem:[%s1120_s6] sm:$0xf] %vm353_vm2, %v615_v35  ;;  %357 = vst.msk [vmem:[%s1120_s6 + $0xc] sm:$0xf] %vm353_vm2, %v618_v39 }
  0xe5   :  { %542 = vst.msk [vmem:[%s1119_s7 + $0x8] sm:$0xff] %vm540_vm1, %v465_v40  ;;  %v669_v42 = vpop.f32.mrb[4].mxu0 }
  0xe6   :  { %355 = vst.msk [vmem:[%s1120_s6 + $0x4] sm:$0xf] %vm353_vm2, %v616_v41  ;;  %v219_v43 = vadd.f32 %v669_v42, %v906_v20  ;;  %v693_v44 = vpop.f32.mrb[4].mxu1  ;;  %v210_v45 = vpop.f32.mrb[5].mxu0 }
  0xe7   :  { %v486_v46 = vadd.f32 %v693_v44, %v911_v21  ;;  %v211_v47 = vadd.f32 %v906_v20, %v210_v45  ;;  %v477_v48 = vpop.f32.mrb[5].mxu1  ;;  %v670_v49 = vpop.f32.mrb[6].mxu0 }
  0xe8   :  { %v621_v50 = vpack.c.bf16 %v219_v43, %v219_v43  ;;  %v478_v51 = vadd.f32 %v911_v21, %v477_v48  ;;  %v222_v52 = vadd.f32 %v670_v49, %v906_v20  ;;  %v694_v53 = vpop.f32.mrb[6].mxu1  ;;  %v213_v54 = vpop.f32.mrb[7].mxu0 }
  0xe9   :  { %547 = vst.msk [vmem:[%s1119_s7 + $0x30] sm:$0xff] %vm540_vm1, %v486_v46  ;;  %v619_v55 = vpack.c.bf16 %v211_v47, %v211_v47  ;;  %v489_v56 = vadd.f32 %v694_v53, %v911_v21  ;;  %v214_v57 = vadd.f32 %v906_v20, %v213_v54  ;;  %v480_v58 = vpop.f32.mrb[7].mxu1 }
  0xea   :  { %360 = vst.msk [vmem:[%s1120_s6 + $0x18] sm:$0xf] %vm353_vm2, %v621_v50  ;;  %v622_v59 = vpack.c.bf16 %v222_v52, %v222_v52  ;;  %v481_v60 = vadd.f32 %v911_v21, %v480_v58 }
  0xeb   :  { %545 = vst.msk [vmem:[%s1119_s7 + $0x20] sm:$0xff] %vm540_vm1, %v478_v51  ;;  %548 = vst.msk [vmem:[%s1119_s7 + $0x38] sm:$0xff] %vm540_vm1, %v489_v56  ;;  %v620_v61 = vpack.c.bf16 %v214_v57, %v214_v57 }
  0xec   :  { %358 = vst.msk [vmem:[%s1120_s6 + $0x10] sm:$0xf] %vm353_vm2, %v619_v55  ;;  %361 = vst.msk [vmem:[%s1120_s6 + $0x1c] sm:$0xf] %vm353_vm2, %v622_v59 }
  0xed   :  { %546 = vst.msk [vmem:[%s1119_s7 + $0x28] sm:$0xff] %vm540_vm1, %v481_v60  ;;  %v673_v62 = vpop.f32.mrb[8].mxu0 }
  0xee   :  { %359 = vst.msk [vmem:[%s1120_s6 + $0x14] sm:$0xf] %vm353_vm2, %v620_v61  ;;  %v235_v63 = vadd.f32 %v673_v62, %v906_v20  ;;  %v697_v0 = vpop.f32.mrb[8].mxu1  ;;  %v226_v1 = vpop.f32.mrb[9].mxu0 }
  0xef   :  { %v502_v2 = vadd.f32 %v697_v0, %v911_v21  ;;  %v227_v3 = vadd.f32 %v906_v20, %v226_v1  ;;  %v493_v4 = vpop.f32.mrb[9].mxu1  ;;  %v674_v5 = vpop.f32.mrb[10].mxu0 }
  0xf0   :  { %v625_v6 = vpack.c.bf16 %v235_v63, %v235_v63  ;;  %v494_v7 = vadd.f32 %v911_v21, %v493_v4  ;;  %v238_v8 = vadd.f32 %v674_v5, %v906_v20  ;;  %v698_v9 = vpop.f32.mrb[10].mxu1  ;;  %v229_v10 = vpop.f32.mrb[11].mxu0 }
  0xf1   :  { %551 = vst.msk [vmem:[%s1119_s7 + $0x50] sm:$0xff] %vm540_vm1, %v502_v2  ;;  %v623_v11 = vpack.c.bf16 %v227_v3, %v227_v3  ;;  %v505_v12 = vadd.f32 %v698_v9, %v911_v21  ;;  %v230_v13 = vadd.f32 %v906_v20, %v229_v10  ;;  %v496_v14 = vpop.f32.mrb[11].mxu1 }
  0xf2   :  { %364 = vst.msk [vmem:[%s1120_s6 + $0x28] sm:$0xf] %vm353_vm2, %v625_v6  ;;  %v626_v15 = vpack.c.bf16 %v238_v8, %v238_v8  ;;  %v497_v16 = vadd.f32 %v911_v21, %v496_v14 }
  0xf3   :  { %549 = vst.msk [vmem:[%s1119_s7 + $0x40] sm:$0xff] %vm540_vm1, %v494_v7  ;;  %552 = vst.msk [vmem:[%s1119_s7 + $0x58] sm:$0xff] %vm540_vm1, %v505_v12  ;;  %v624_v17 = vpack.c.bf16 %v230_v13, %v230_v13 }
  0xf4   :  { %362 = vst.msk [vmem:[%s1120_s6 + $0x20] sm:$0xf] %vm353_vm2, %v623_v11  ;;  %365 = vst.msk [vmem:[%s1120_s6 + $0x2c] sm:$0xf] %vm353_vm2, %v626_v15 }
  0xf5   :  { %550 = vst.msk [vmem:[%s1119_s7 + $0x48] sm:$0xff] %vm540_vm1, %v497_v16  ;;  %v677_v18 = vpop.f32.mrb[12].mxu0 }
  0xf6   :  { %363 = vst.msk [vmem:[%s1120_s6 + $0x24] sm:$0xf] %vm353_vm2, %v624_v17  ;;  %v251_v19 = vadd.f32 %v677_v18, %v906_v20  ;;  %v701_v22 = vpop.f32.mrb[12].mxu1  ;;  %v242_v23 = vpop.f32.mrb[13].mxu0 }
  0xf7   :  { %v518_v24 = vadd.f32 %v701_v22, %v911_v21  ;;  %v243_v25 = vadd.f32 %v906_v20, %v242_v23  ;;  %v509_v26 = vpop.f32.mrb[13].mxu1  ;;  %v678_v27 = vpop.f32.mrb[14].mxu0 }
  0xf8   :  { %v629_v28 = vpack.c.bf16 %v251_v19, %v251_v19  ;;  %v510_v29 = vadd.f32 %v911_v21, %v509_v26  ;;  %v254_v30 = vadd.f32 %v678_v27, %v906_v20  ;;  %v702_v31 = vpop.f32.mrb[14].mxu1  ;;  %v245_v32 = vpop.f32.mrb[15].mxu0 }
  0xf9   :  { %555 = vst.msk [vmem:[%s1119_s7 + $0x70] sm:$0xff] %vm540_vm1, %v518_v24  ;;  %v627_v33 = vpack.c.bf16 %v243_v25, %v243_v25  ;;  %v521_v34 = vadd.f32 %v702_v31, %v911_v21  ;;  %v246_v35 = vadd.f32 %v906_v20, %v245_v32  ;;  %v512_v36 = vpop.f32.mrb[15].mxu1 }
  0xfa   :  { %368 = vst.msk [vmem:[%s1120_s6 + $0x38] sm:$0xf] %vm353_vm2, %v629_v28  ;;  %v630_v37 = vpack.c.bf16 %v254_v30, %v254_v30  ;;  %v513_v38 = vadd.f32 %v911_v21, %v512_v36 }
  0xfb   :  { %553 = vst.msk [vmem:[%s1119_s7 + $0x60] sm:$0xff] %vm540_vm1, %v510_v29  ;;  %556 = vst.msk [vmem:[%s1119_s7 + $0x78] sm:$0xff] %vm540_vm1, %v521_v34  ;;  %v628_v39 = vpack.c.bf16 %v246_v35, %v246_v35 }
  0xfc   :  { %366 = vst.msk [vmem:[%s1120_s6 + $0x30] sm:$0xf] %vm353_vm2, %v627_v33  ;;  %369 = vst.msk [vmem:[%s1120_s6 + $0x3c] sm:$0xf] %vm353_vm2, %v630_v37 }
  0xfd   :  { %554 = vst.msk [vmem:[%s1119_s7 + $0x68] sm:$0xff] %vm540_vm1, %v513_v38  ;;  %v681_v40 = vpop.f32.mrb[16].mxu0 }
  0xfe   :  { %367 = vst.msk [vmem:[%s1120_s6 + $0x34] sm:$0xf] %vm353_vm2, %v628_v39  ;;  %v267_v41 = vadd.f32 %v681_v40, %v906_v20  ;;  %v705_v42 = vpop.f32.mrb[16].mxu1  ;;  %v258_v43 = vpop.f32.mrb[17].mxu0 }
  0xff   :  { %v534_v44 = vadd.f32 %v705_v42, %v911_v21  ;;  %v259_v45 = vadd.f32 %v906_v20, %v258_v43  ;;  %v525_v46 = vpop.f32.mrb[17].mxu1  ;;  %v682_v47 = vpop.f32.mrb[18].mxu0 }
 0x100   :  { %v633_v48 = vpack.c.bf16 %v267_v41, %v267_v41  ;;  %v526_v49 = vadd.f32 %v911_v21, %v525_v46  ;;  %v270_v50 = vadd.f32 %v682_v47, %v906_v20  ;;  %v706_v51 = vpop.f32.mrb[18].mxu1  ;;  %v261_v52 = vpop.f32.mrb[19].mxu0 }
 0x101   :  { %559 = vst.msk [vmem:[%s1119_s7 + $0x90] sm:$0xff] %vm540_vm1, %v534_v44  ;;  %v631_v53 = vpack.c.bf16 %v259_v45, %v259_v45  ;;  %v537_v54 = vadd.f32 %v706_v51, %v911_v21  ;;  %v262_v55 = vadd.f32 %v906_v20, %v261_v52  ;;  %v528_v56 = vpop.f32.mrb[19].mxu1 }
 0x102   :  { %372 = vst.msk [vmem:[%s1120_s6 + $0x48] sm:$0xf] %vm353_vm2, %v633_v48  ;;  %v634_v57 = vpack.c.bf16 %v270_v50, %v270_v50  ;;  %v529_v58 = vadd.f32 %v911_v21, %v528_v56 }
 0x103   :  { %557 = vst.msk [vmem:[%s1119_s7 + $0x80] sm:$0xff] %vm540_vm1, %v526_v49  ;;  %560 = vst.msk [vmem:[%s1119_s7 + $0x98] sm:$0xff] %vm540_vm1, %v537_v54  ;;  %v632_v20 = vpack.c.bf16 %v262_v55, %v262_v55 }
 0x104   :  { %370 = vst.msk [vmem:[%s1120_s6 + $0x40] sm:$0xf] %vm353_vm2, %v631_v53  ;;  %373 = vst.msk [vmem:[%s1120_s6 + $0x4c] sm:$0xf] %vm353_vm2, %v634_v57 }
 0x105   :  { %558 = vst.msk [vmem:[%s1119_s7 + $0x88] sm:$0xff] %vm540_vm1, %v529_v58 }
 0x106   :  { %371 = vst.msk [vmem:[%s1120_s6 + $0x44] sm:$0xf] %vm353_vm2, %v632_v20 }

</bundles_post_ra>
